<compile_context>
chip_gen: v7x
topology: tpu7x:2x2x1
jax: 0.10.0
libtpu: 0.0.40
codegen_flags: <defaults>
</compile_context>

<pallas_src>
import functools

import jax
import jax.numpy as jnp
from jax.experimental import pallas as pl
from jax.experimental.pallas import tpu as pltpu

_LANES = 128
_CHUNK_ROWS = 256   # rows per in-kernel slab (keeps temporaries ~256 KiB)


def _cdiv(a, b):
    return -(-a // b)


def _align_up(x, m):
    return _cdiv(x, m) * m


def _vmem_capacity_bytes():
    """Physical VMEM per TensorCore; conservative fallback if query fails."""
    try:
        cap = getattr(pltpu.get_tpu_info(), "vmem_capacity_bytes", None)
        if cap:
            return int(cap)
    except Exception:
        pass
    return 64 * 1024 * 1024   # v7x-sized conservative default


def _default_n_split():
    """2-way 'parallel' split only where a second TensorCore exists (v7x)."""
    try:
        kind = jax.devices()[0].device_kind.lower()
    except Exception:
        return 1
    return 2 if "v7" in kind else 1


def _choose_tiling(n_rows, max_row_tile, n_split):
    """Pick (n_split, row_tile, n_tiles) such that n_split*n_tiles row-blocks of
    row_tile rows cover n_rows with NO phantom (fully-masked) blocks."""
    max_row_tile = max(8, (max_row_tile // 8) * 8)
    if n_split >= 2 and n_rows >= 16:
        # Largest 8-aligned tile <= budget whose block count is even.
        rt = min(max_row_tile, _align_up(_cdiv(n_rows, 2), 8))
        while rt >= 8:
            nb = _cdiv(n_rows, rt)
            if nb % 2 == 0:
                return 2, rt, nb // 2
            rt -= 8
    # Single-split fallback.
    rt = min(max_row_tile, _align_up(n_rows, 8))
    return 1, rt, _cdiv(n_rows, rt)


def _dice_partial_kernel(t_ref, l_ref, inter_ref, lsum_ref, tsum_ref, *,
                         batch, n_rows, row_tile, n_tiles, chunk, has_tail):
    """One (split, row-tile) grid step.

    Block shapes:
      t_ref / l_ref : (B, row_tile, 128)   native dtype (widened in-kernel)
      *_ref outputs : (1, B, 128) f32      resident across k => accumulators
    """
    s = pl.program_id(0)    # TensorCore split ("parallel")
    k = pl.program_id(1)    # row-tile within split ("arbitrary" reduction axis)
    blk = s * n_tiles + k   # global row-block index (no phantom blocks)

    @pl.when(k == 0)
    def _init():
        inter_ref[...] = jnp.zeros_like(inter_ref)
        lsum_ref[...] = jnp.zeros_like(lsum_ref)
        tsum_ref[...] = jnp.zeros_like(tsum_ref)

    def tile_partials(masked):
        """Fused single pass over the tile in small slabs -> (B,128) partials."""
        row0 = blk * row_tile

        def slab(off, size, carry):
            inter, lsum, tsum = carry
            t = t_ref[:, pl.ds(off, size), :].astype(jnp.float32)
            l = l_ref[:, pl.ds(off, size), :].astype(jnp.float32)
            m = l > 0.5
            if masked:
                rows = row0 + off + jax.lax.broadcasted_iota(
                    jnp.int32, (batch, size, _LANES), 1)
                valid = rows < n_rows
                m = jnp.logical_and(m, valid)
                t = jnp.where(valid, t, 0.0)
            # No explicit multiply: intersection = where(mask, t, 0); the same
            # 0/1 mask feeds lsum.  axis=1 reduces are sublane-direction adds.
            inter = inter + jnp.sum(jnp.where(m, t, 0.0), axis=1)
            lsum = lsum + jnp.sum(m.astype(jnp.float32), axis=1)
            tsum = tsum + jnp.sum(t, axis=1)
            return inter, lsum, tsum

        zero = jnp.zeros((batch, _LANES), jnp.float32)
        carry = (zero, zero, zero)
        n_full = row_tile // chunk
        rem = row_tile - n_full * chunk
        if n_full == 1 and rem == 0:
            carry = slab(0, chunk, carry)
        elif n_full > 0:
            carry = jax.lax.fori_loop(
                0, n_full,
                lambda i, c: slab(pl.multiple_of(i * chunk, 8), chunk, c),
                carry)
        if rem > 0:
            carry = slab(n_full * chunk, rem, carry)   # static trailing slab
        return carry

    def flush(carry):
        inter, lsum, tsum = carry
        inter_ref[...] += inter[None]
        lsum_ref[...] += lsum[None]
        tsum_ref[...] += tsum[None]

    if not has_tail:
        # Trace-time specialization: tiles cover n_rows exactly -> no masks,
        # no iota, no per-step predicate.
        flush(tile_partials(masked=False))
    else:
        is_tail = blk == (pl.num_programs(0) * n_tiles - 1)

        @pl.when(jnp.logical_not(is_tail))
        def _full():
            flush(tile_partials(masked=False))

        @pl.when(is_tail)
        def _tail():
            flush(tile_partials(masked=True))


def dice_coefficient(targets, logits, epsilon=1e-4, *,
                     vmem_input_budget=None, n_split=None):
    """Pallas implementation of the PyTorch dice_coefficient module."""
    assert targets.shape == logits.shape, (targets.shape, logits.shape)
    batch = targets.shape[0]
    feat = targets.size // batch

    # Flatten per sample (same as .view(batch, -1)); keep native dtypes -- the
    # threshold / f32 widening happens in-kernel so HBM traffic stays at the
    # inputs' native width.
    t2 = jnp.reshape(targets, (batch, feat))
    l2 = jnp.reshape(logits, (batch, feat))

    if feat % _LANES:
        # TODO(synk): only fires when C*H*W is not 128-lane aligned; pad the
        # ragged lane tail so features pack into (rows, 128) sublane-dense
        # blocks.  Zero padding is neutral (0.0 > 0.5 is False; zero targets
        # add 0 to every partial sum).
        pad = _LANES - feat % _LANES
        t2 = jnp.pad(t2, ((0, 0), (0, pad)))
        l2 = jnp.pad(l2, ((0, 0), (0, pad)))
    n_rows = t2.shape[1] // _LANES

    # Sublane-dense layout: (B, F) -> (B, n_rows, 128).  Row-major contiguous,
    # so this reshape is free; vregs are fully occupied even for tiny batch.
    t3 = jnp.reshape(t2, (batch, n_rows, _LANES))
    l3 = jnp.reshape(l2, (batch, n_rows, _LANES))

    # ---- generation-aware VMEM sizing -------------------------------------
    vmem_cap = _vmem_capacity_bytes()                       # 64 MiB (v7x) / 128 MiB
    vmem_limit = max(32 * 1024 * 1024,
                     min(vmem_cap - 16 * 1024 * 1024, 96 * 1024 * 1024))
    if vmem_input_budget is None:
        # Leave headroom for slab temporaries (<~1 MiB) + outputs + scratch.
        vmem_input_budget = vmem_limit - 8 * 1024 * 1024
    bytes_per_row = 2 * batch * _LANES * (t3.dtype.itemsize + l3.dtype.itemsize)
    max_row_tile = max(8, vmem_input_budget // bytes_per_row)

    # ---- grid / tiling ------------------------------------------------------
    if n_split is None:
        n_split = _default_n_split()
    n_split, row_tile, n_tiles = _choose_tiling(n_rows, max_row_tile, n_split)
    has_tail = (n_rows % row_tile) != 0
    chunk = min(row_tile, _CHUNK_ROWS)

    in_idx = lambda s, k: (0, s * n_tiles + k, 0)
    out_idx = lambda s, k: (s, 0, 0)

    kernel = functools.partial(
        _dice_partial_kernel, batch=batch, n_rows=n_rows, row_tile=row_tile,
        n_tiles=n_tiles, chunk=chunk, has_tail=has_tail)

    out_sds = jax.ShapeDtypeStruct((n_split, batch, _LANES), jnp.float32)
    inter_p, lsum_p, tsum_p = pl.pallas_call(
        kernel,
        out_shape=(out_sds, out_sds, out_sds),
        grid_spec=pltpu.PrefetchScalarGridSpec(
            num_scalar_prefetch=0,
            grid=(n_split, n_tiles),
            in_specs=[
                pl.BlockSpec((batch, row_tile, _LANES), in_idx),
                pl.BlockSpec((batch, row_tile, _LANES), in_idx),
            ],
            out_specs=(
                pl.BlockSpec((1, batch, _LANES), out_idx),
                pl.BlockSpec((1, batch, _LANES), out_idx),
                pl.BlockSpec((1, batch, _LANES), out_idx),
            ),
        ),
        compiler_params=pltpu.CompilerParams(
            dimension_semantics=("parallel", "arbitrary"),
            vmem_limit_bytes=int(vmem_limit),
        ),
    )(t3, l3)

    # Tiny epilogue glue: one cross-lane reduce over (n_split, B, 128) partials,
    # then the dice ratio and batch mean (a handful of scalars).
    inter = jnp.sum(inter_p, axis=(0, 2))
    lsum = jnp.sum(lsum_p, axis=(0, 2))
    tsum = jnp.sum(tsum_p, axis=(0, 2))
    dice = (2.0 * inter + epsilon) / (lsum + tsum + epsilon)
    return jnp.mean(dice)


def _reference(targets, logits, epsilon=1e-4):
    batch = targets.shape[0]
    l = (jnp.reshape(logits, (batch, -1)) > 0.5).astype(jnp.float32)
    t = jnp.reshape(targets, (batch, -1)).astype(jnp.float32)
    inter = jnp.sum(l * t, axis=-1)
    dice = (2.0 * inter + epsilon) / (jnp.sum(l, -1) + jnp.sum(t, -1) + epsilon)
    return jnp.mean(dice)


if __name__ == "__main__":
    key = jax.random.PRNGKey(0)
    k1, k2, k3, k4, k5, k6 = jax.random.split(key, 6)

    # Case 1: main example — NCHW, batch=2, channels=4, 16x16 (F=1024),
    # lane-aligned, single block, full path only (no masking compiled).
    shape = (2, 4, 16, 16)
    t1 = (jax.random.uniform(k1, shape) > 0.5).astype(jnp.float32)
    l1 = jax.random.uniform(k2, shape, dtype=jnp.float32)
    out1 = jax.block_until_ready(dice_coefficient(t1, l1))
    ref1 = _reference(t1, l1)
    assert jnp.allclose(out1, ref1, atol=1e-5, rtol=1e-4), (out1, ref1)

    # Case 2: ragged lane tail + several row-blocks + in-kernel row masking,
    # single split (F = 3*40*40 = 4800; tiny budget forces multiple tiles).
    shape2 = (2, 3, 40, 40)
    t2 = (jax.random.uniform(k3, shape2) > 0.5).astype(jnp.float32)
    l2 = jax.random.uniform(k4, shape2, dtype=jnp.float32)
    ref2 = _reference(t2, l2)
    out2 = jax.block_until_ready(
        dice_coefficient(t2, l2, vmem_input_budget=64 * 1024, n_split=1))
    assert jnp.allclose(out2, ref2, atol=1e-5, rtol=1e-4), (out2, ref2)

    # Case 3: forced 2-way split (v7x path) with a partial trailing block —
    # phantom-free even-block tiling + masked tail on the last block only.
    out3 = jax.block_until_ready(
        dice_coefficient(t2, l2, vmem_input_budget=96 * 1024, n_split=2))
    assert jnp.allclose(out3, ref2, atol=1e-5, rtol=1e-4), (out3, ref2)

    # Case 4: narrow-dtype streaming (bf16 logits widened in-kernel),
    # 2-way split, exact coverage (no tail path compiled).
    shape4 = (2, 4, 32, 32)
    t4 = (jax.random.uniform(k5, shape4) > 0.5).astype(jnp.float32)
    l4 = jax.random.uniform(k6, shape4, dtype=jnp.float32).astype(jnp.bfloat16)
    out4 = jax.block_until_ready(
        dice_coefficient(t4, l4, vmem_input_budget=64 * 1024, n_split=2))
    ref4 = _reference(t4, l4)
    assert jnp.allclose(out4, ref4, atol=1e-5, rtol=1e-4), (out4, ref4)

    print("KERNEL_OK")
</pallas_src>

<mosaic_0001>
module attributes {stable_mosaic.version = 11 : i64} {
  func.func @_dice_partial_kernel(%arg0: i32, %arg1: i32, %arg2: memref<2x8x128xf32, #tpu.memory_space<vmem>>, %arg3: memref<2x8x128xf32, #tpu.memory_space<vmem>>, %arg4: memref<1x2x128xf32, #tpu.memory_space<vmem>>, %arg5: memref<1x2x128xf32, #tpu.memory_space<vmem>>, %arg6: memref<1x2x128xf32, #tpu.memory_space<vmem>>) attributes {dimension_semantics = [#tpu.dimension_semantics<parallel>, #tpu.dimension_semantics<arbitrary>], iteration_bounds = array<i64: 1, 1>, scalar_prefetch = 0 : i64, scratch_operands = 0 : i64, tpu.core_type = #tpu.core_type<tc>, window_params = [{transform_indices = @transform_0, window_bounds = array<i64: 2, 8, 128>}, {transform_indices = @transform_1, window_bounds = array<i64: 2, 8, 128>}, {transform_indices = @transform_2, window_bounds = array<i64: 1, 2, 128>}, {transform_indices = @transform_3, window_bounds = array<i64: 1, 2, 128>}, {transform_indices = @transform_4, window_bounds = array<i64: 1, 2, 128>}]} {
    %c0_i32 = arith.constant 0 : i32
    %0 = arith.cmpi eq, %arg1, %c0_i32 : i32
    %1 = arith.extui %0 : i1 to i32
    %c0_i32_0 = arith.constant 0 : i32
    %2 = arith.cmpi ne, %1, %c0_i32_0 : i32
    scf.if %2 {
      %cst_29 = arith.constant 0.000000e+00 : f32
      %30 = vector.broadcast %cst_29 : f32 to vector<1x2x128xf32>
      %c0_30 = arith.constant 0 : index
      %c0_31 = arith.constant 0 : index
      %c0_32 = arith.constant 0 : index
      %31 = vector.load %arg4[%c0_30, %c0_31, %c0_32] : memref<1x2x128xf32, #tpu.memory_space<vmem>>, vector<1x2x128xf32>
      tpu.vector_store %arg4[%c0_30, %c0_31, %c0_32], %30 {strides = array<i32>} : memref<1x2x128xf32, #tpu.memory_space<vmem>>, vector<1x2x128xf32>,
      %cst_33 = arith.constant 0.000000e+00 : f32
      %32 = vector.broadcast %cst_33 : f32 to vector<1x2x128xf32>
      %c0_34 = arith.constant 0 : index
      %c0_35 = arith.constant 0 : index
      %c0_36 = arith.constant 0 : index
      %33 = vector.load %arg5[%c0_34, %c0_35, %c0_36] : memref<1x2x128xf32, #tpu.memory_space<vmem>>, vector<1x2x128xf32>
      tpu.vector_store %arg5[%c0_34, %c0_35, %c0_36], %32 {strides = array<i32>} : memref<1x2x128xf32, #tpu.memory_space<vmem>>, vector<1x2x128xf32>,
      %cst_37 = arith.constant 0.000000e+00 : f32
      %34 = vector.broadcast %cst_37 : f32 to vector<1x2x128xf32>
      %c0_38 = arith.constant 0 : index
      %c0_39 = arith.constant 0 : index
      %c0_40 = arith.constant 0 : index
      %35 = vector.load %arg6[%c0_38, %c0_39, %c0_40] : memref<1x2x128xf32, #tpu.memory_space<vmem>>, vector<1x2x128xf32>
      tpu.vector_store %arg6[%c0_38, %c0_39, %c0_40], %34 {strides = array<i32>} : memref<1x2x128xf32, #tpu.memory_space<vmem>>, vector<1x2x128xf32>,
    } else {
    }
    %cst = arith.constant 0.000000e+00 : f32
    %3 = vector.broadcast %cst : f32 to vector<2x128xf32>
    %c0 = arith.constant 0 : index
    %c0_1 = arith.constant 0 : index
    %c0_2 = arith.constant 0 : index
    %4 = vector.load %arg2[%c0, %c0_1, %c0_2] : memref<2x8x128xf32, #tpu.memory_space<vmem>>, vector<2x8x128xf32>
    %c0_3 = arith.constant 0 : index
    %c0_4 = arith.constant 0 : index
    %c0_5 = arith.constant 0 : index
    %5 = vector.load %arg3[%c0_3, %c0_4, %c0_5] : memref<2x8x128xf32, #tpu.memory_space<vmem>>, vector<2x8x128xf32>
    %cst_6 = arith.constant 5.000000e-01 : f32
    %6 = vector.broadcast %cst_6 : f32 to vector<2x8x128xf32>
    %7 = arith.cmpf ogt, %5, %6 : vector<2x8x128xf32>
    %cst_7 = arith.constant 0.000000e+00 : f32
    %8 = vector.broadcast %cst_7 : f32 to vector<2x8x128xf32>
    %9 = arith.select %7, %4, %8 : vector<2x8x128xi1>, vector<2x8x128xf32>
    %cst_8 = arith.constant dense<0.000000e+00> : vector<2x128xf32>
    %10 = vector.multi_reduction <add>, %9, %cst_8 [1] : vector<2x8x128xf32> to vector<2x128xf32>
    %11 = arith.addf %3, %10 : vector<2x128xf32>
    %12 = arith.extui %7 : vector<2x8x128xi1> to vector<2x8x128xi32>
    %13 = arith.sitofp %12 : vector<2x8x128xi32> to vector<2x8x128xf32>
    %cst_9 = arith.constant dense<0.000000e+00> : vector<2x128xf32>
    %14 = vector.multi_reduction <add>, %13, %cst_9 [1] : vector<2x8x128xf32> to vector<2x128xf32>
    %15 = arith.addf %3, %14 : vector<2x128xf32>
    %cst_10 = arith.constant dense<0.000000e+00> : vector<2x128xf32>
    %16 = vector.multi_reduction <add>, %4, %cst_10 [1] : vector<2x8x128xf32> to vector<2x128xf32>
    %17 = arith.addf %3, %16 : vector<2x128xf32>
    %c0_11 = arith.constant 0 : index
    %c0_12 = arith.constant 0 : index
    %c0_13 = arith.constant 0 : index
    %18 = vector.load %arg4[%c0_11, %c0_12, %c0_13] : memref<1x2x128xf32, #tpu.memory_space<vmem>>, vector<1x2x128xf32>
    %19 = vector.shape_cast %11 : vector<2x128xf32> to vector<1x2x128xf32>
    %20 = arith.addf %18, %19 : vector<1x2x128xf32>
    %c0_14 = arith.constant 0 : index
    %c0_15 = arith.constant 0 : index
    %c0_16 = arith.constant 0 : index
    %21 = vector.load %arg4[%c0_14, %c0_15, %c0_16] : memref<1x2x128xf32, #tpu.memory_space<vmem>>, vector<1x2x128xf32>
    tpu.vector_store %arg4[%c0_14, %c0_15, %c0_16], %20 {strides = array<i32>} : memref<1x2x128xf32, #tpu.memory_space<vmem>>, vector<1x2x128xf32>,
    %c0_17 = arith.constant 0 : index
    %c0_18 = arith.constant 0 : index
    %c0_19 = arith.constant 0 : index
    %22 = vector.load %arg5[%c0_17, %c0_18, %c0_19] : memref<1x2x128xf32, #tpu.memory_space<vmem>>, vector<1x2x128xf32>
    %23 = vector.shape_cast %15 : vector<2x128xf32> to vector<1x2x128xf32>
    %24 = arith.addf %22, %23 : vector<1x2x128xf32>
    %c0_20 = arith.constant 0 : index
    %c0_21 = arith.constant 0 : index
    %c0_22 = arith.constant 0 : index
    %25 = vector.load %arg5[%c0_20, %c0_21, %c0_22] : memref<1x2x128xf32, #tpu.memory_space<vmem>>, vector<1x2x128xf32>
    tpu.vector_store %arg5[%c0_20, %c0_21, %c0_22], %24 {strides = array<i32>} : memref<1x2x128xf32, #tpu.memory_space<vmem>>, vector<1x2x128xf32>,
    %c0_23 = arith.constant 0 : index
    %c0_24 = arith.constant 0 : index
    %c0_25 = arith.constant 0 : index
    %26 = vector.load %arg6[%c0_23, %c0_24, %c0_25] : memref<1x2x128xf32, #tpu.memory_space<vmem>>, vector<1x2x128xf32>
    %27 = vector.shape_cast %17 : vector<2x128xf32> to vector<1x2x128xf32>
    %28 = arith.addf %26, %27 : vector<1x2x128xf32>
    %c0_26 = arith.constant 0 : index
    %c0_27 = arith.constant 0 : index
    %c0_28 = arith.constant 0 : index
    %29 = vector.load %arg6[%c0_26, %c0_27, %c0_28] : memref<1x2x128xf32, #tpu.memory_space<vmem>>, vector<1x2x128xf32>
    tpu.vector_store %arg6[%c0_26, %c0_27, %c0_28], %28 {strides = array<i32>} : memref<1x2x128xf32, #tpu.memory_space<vmem>>, vector<1x2x128xf32>,
    return
  }
  func.func @transform_0(%arg0: i32, %arg1: i32) -> (i32, i32, i32) {
    %c1_i32 = arith.constant 1 : i32
    %0 = arith.muli %arg0, %c1_i32 : i32
    %1 = arith.addi %0, %arg1 : i32
    %c0_i32 = arith.constant 0 : i32
    %c0_i32_0 = arith.constant 0 : i32
    %c0_i32_1 = arith.constant 0 : i32
    return %c0_i32, %1, %c0_i32_0 : i32, i32, i32
  }
  func.func @transform_1(%arg0: i32, %arg1: i32) -> (i32, i32, i32) {
    %c1_i32 = arith.constant 1 : i32
    %0 = arith.muli %arg0, %c1_i32 : i32
    %1 = arith.addi %0, %arg1 : i32
    %c0_i32 = arith.constant 0 : i32
    %c0_i32_0 = arith.constant 0 : i32
    %c0_i32_1 = arith.constant 0 : i32
    return %c0_i32, %1, %c0_i32_0 : i32, i32, i32
  }
  func.func @transform_2(%arg0: i32, %arg1: i32) -> (i32, i32, i32) {
    %c0_i32 = arith.constant 0 : i32
    %c0_i32_0 = arith.constant 0 : i32
    %c0_i32_1 = arith.constant 0 : i32
    return %arg0, %c0_i32, %c0_i32_0 : i32, i32, i32
  }
  func.func @transform_3(%arg0: i32, %arg1: i32) -> (i32, i32, i32) {
    %c0_i32 = arith.constant 0 : i32
    %c0_i32_0 = arith.constant 0 : i32
    %c0_i32_1 = arith.constant 0 : i32
    return %arg0, %c0_i32, %c0_i32_0 : i32, i32, i32
  }
  func.func @transform_4(%arg0: i32, %arg1: i32) -> (i32, i32, i32) {
    %c0_i32 = arith.constant 0 : i32
    %c0_i32_0 = arith.constant 0 : i32
    %c0_i32_1 = arith.constant 0 : i32
    return %arg0, %c0_i32, %c0_i32_0 : i32, i32, i32
  }
}

</mosaic_0001>

<bundles_post_ra>
// kernel: tpu_custom_call.1
= control target key start
LH: loop header
LB: loop body
LE: loop exit
PB: predicated region body
PF: predicated region fallthrough
CT: control target
= control target key end

     0   :  { %10 = vsyncpa [#allocation3], 0  ;;  %s413_s0 = inlined_call_operand.hbm [shape: f32[2,8,128], index: 0, kind: input, shape index: {}]   ;;  %s414_s1 = inlined_call_operand.hbm [shape: f32[2,8,128], index: 1, kind: input, shape index: {}]   ;;  %s415_s2 = inlined_call_operand.hbm [shape: f32[1,2,128], index: 2, kind: output, shape index: {0}]   ;;  %s416_s3 = inlined_call_operand.hbm [shape: f32[1,2,128], index: 3, kind: output, shape index: {1}]   ;;  %s417_s4 = inlined_call_operand.hbm [shape: f32[1,2,128], index: 4, kind: output, shape index: {2}]  }
   0x1   :  { %11 = vsyncpa [#allocation6], 0 }
   0x2   :  { %12 = vsyncpa [#allocation4], 0 }
   0x3   :  { %13 = vsyncpa [#allocation9], 0  ;;  %s306_s15 = smov [#allocation2]   ;;  %s188_s19 = scalar_lea.hbm %s413_s0, 256 }
   0x4   :  { %s22_s16 = sshll.u32 %s306_s15, 4  ;;  %p189_p0 = scmp.ne.s32.totalorder %s413_s0, %s188_s19  ;;  %s23_s16 = int_to_ptr.vmem [resolvable:$true] %s22_s16 }
   0x5   :  { %p192_p1 = scmp.lt.u32.totalorder %s188_s19, %s413_s0 }
   0x7   :  { %p194_p2 = pnand %p192_p1, %p189_p0 }
   0x9   :  { %197 = shalt.err (!%p194_p2)
}
   0xa   :  { %s198_s24 = scalar_lea.vmem %s23_s16, 256  ;;  %p203_p4 = scmp.lt.s32.totalorder %s23_s16, %s23_s16 }
   0xb   :  { %p199_p3 = scmp.ne.s32.totalorder %s23_s16, %s198_s24  ;;  %p204_p5 = scmp.lt.s32.totalorder %s198_s24, %s198_s24 }
   0xd   :  { %p205_p6 = por %p204_p5, %p203_p4 }
   0xf   :  { %p206_p7 = pnand %p205_p6, %p199_p3 }
  0x11   :  { %209 = shalt.err (!%p206_p7)
}
  0x12   :  { %s307_s25 = smov 128   ;;  %s308_s26 = smov 8  }
  0x13   :  { %28 = dma.hbm_to_vmem [thread:$0]  %s413_s0, 256, %s23_s16, [#allocation3], %s307_s25, %s307_s25, %s308_s26  }
  0x14   :  { %s309_s29 = smov [#allocation5]   ;;  %s210_s7 = scalar_lea.hbm %s414_s1, 256 }
  0x15   :  { %s37_s30 = sshll.u32 %s309_s29, 4  ;;  %p211_p8 = scmp.ne.s32.totalorder %s414_s1, %s210_s7  ;;  %s38_s30 = int_to_ptr.vmem [resolvable:$true] %s37_s30 }
  0x16   :  { %p214_p9 = scmp.lt.u32.totalorder %s210_s7, %s414_s1 }
  0x18   :  { %p216_p10 = pnand %p214_p9, %p211_p8 }
  0x1a   :  { %219 = shalt.err (!%p216_p10)
}
  0x1b   :  { %s220_s12 = scalar_lea.vmem %s38_s30, 256  ;;  %p225_p12 = scmp.lt.s32.totalorder %s38_s30, %s38_s30 }
  0x1c   :  { %p221_p11 = scmp.ne.s32.totalorder %s38_s30, %s220_s12  ;;  %p226_p13 = scmp.lt.s32.totalorder %s220_s12, %s220_s12 }
  0x1e   :  { %p227_p0 = por %p226_p13, %p225_p12 }
  0x20   :  { %p228_p1 = pnand %p227_p0, %p221_p11 }
  0x22   :  { %231 = shalt.err (!%p228_p1)
}
  0x23   :  { %43 = dma.hbm_to_vmem [thread:$0]  %s414_s1, 256, %s38_s30, [#allocation6], %s307_s25, %s307_s25, %s308_s26  }
  0x24   :  { %298 = dma.done.wait [#allocation3], 256  }
  0x25   :  { %299 = vsyncadd [#allocation3], 4294967040 }
  0x26   :  { %300 = dma.done.wait [#allocation6], 256  }
  0x27   :  { %301 = vsyncadd [#allocation6], 4294967040  ;;  %v310_v0 = vmov 0.0   ;;  %v59_v1 = vld [vmem:[#allocation2] sm:$0xff]  ;;  %v60_v2 = vld [vmem:[#allocation2 + $0x8] sm:$0xff]  ;;  %vm116_vm2 = vcmask 1041409  }
  0x28   :  { %57 = vst [vmem:[#allocation8] sm:$0x3] %v310_v0  ;;  %56 = vst [vmem:[#allocation7] sm:$0x3] %v310_v0  ;;  %v61_v3 = vld [vmem:[#allocation5] sm:$0xff]  ;;  %v62_v4 = vld [vmem:[#allocation5 + $0x8] sm:$0xff] }
  0x29   :  { %58 = vst [vmem:[#allocation10] sm:$0x3] %v310_v0  ;;  %vm63_vm0 = vcmp.gt.f32.partialorder %v61_v3, 0.5  ;;  %vm64_vm1 = vcmp.gt.f32.partialorder %v62_v4, 0.5  ;;  %v99_v7 = vrot.slane %v59_v1, 4  ;;  %v105_v15 = vrot.slane %v60_v2, 4 }
  0x2a   :  { %v65_v5 = vsel %vm63_vm0, %v59_v1, 0.0  ;;  %v178_v6 = vsel %vm63_vm0, 1.0, %v310_v0  ;;  %v66_v8 = vsel %vm64_vm1, %v60_v2, 0.0  ;;  %v179_v10 = vsel %vm64_vm1, 1.0, %v310_v0  ;;  %s311_s1 = smov [#allocation8]   ;;  %s312_s15 = smov [#allocation7]  }
  0x2b   :  { %v67_v9 = vrot.slane %v65_v5, 4  ;;  %v85_v11 = vrot.slane %v178_v6, 4  ;;  %v73_v12 = vrot.slane %v66_v8, 4  ;;  %v91_v13 = vrot.slane %v179_v10, 4  ;;  %s151_s14 = sshll.u32 %s311_s1, 4  ;;  %s141_s16 = sshll.u32 %s312_s15, 4  ;;  %s152_s14 = int_to_ptr.vmem [resolvable:$true] %s151_s14  ;;  %s363_s16 = int_to_ptr.vmem [resolvable:$true] %s141_s16 }
  0x2c   :  { %v100_v14 = vadd.f32 %v99_v7, %v59_v1  ;;  %v106_v21 = vadd.f32 %v105_v15, %v60_v2  ;;  %s313_s17 = smov [#allocation10]   ;;  %s232_s19 = scalar_lea.vmem %s152_s14, 32 }
  0x2d   :  { %v86_v16 = vadd.f32 %v178_v6, %v85_v11  ;;  %v68_v17 = vadd.f32 %v67_v9, %v65_v5  ;;  %v92_v18 = vadd.f32 %v179_v10, %v91_v13  ;;  %v74_v19 = vadd.f32 %v73_v12, %v66_v8  ;;  %s161_s18 = sshll.u32 %s313_s17, 4  ;;  %p233_p2 = scmp.ne.s32.totalorder %s152_s14, %s232_s19  ;;  %s365_s18 = int_to_ptr.vmem [resolvable:$true] %s161_s18 }
  0x2e   :  { %v101_v20 = vrot.slane %v100_v14, 2  ;;  %v107_v27 = vrot.slane %v106_v21, 2  ;;  %p237_p3 = scmp.lt.s32.totalorder %s152_s14, %s152_s14  ;;  %p238_p4 = scmp.lt.s32.totalorder %s232_s19, %s232_s19 }
  0x2f   :  { %v87_v22 = vrot.slane %v86_v16, 2  ;;  %v69_v23 = vrot.slane %v68_v17, 2  ;;  %v93_v24 = vrot.slane %v92_v18, 2  ;;  %v75_v25 = vrot.slane %v74_v19, 2  ;;  %v121_v43 = vld [vmem:[#allocation8] sm:$0x3] }
  0x30   :  { %v102_v26 = vadd.f32 %v101_v20, %v100_v14  ;;  %v108_v33 = vadd.f32 %v107_v27, %v106_v21  ;;  %v113_v45 = vld [vmem:[#allocation7] sm:$0x3]  ;;  %v128_v47 = vld [vmem:[#allocation10] sm:$0x3]  ;;  %p239_p5 = por %p238_p4, %p237_p3 }
  0x31   :  { %v88_v28 = vadd.f32 %v87_v22, %v86_v16  ;;  %v70_v29 = vadd.f32 %v69_v23, %v68_v17  ;;  %v94_v30 = vadd.f32 %v93_v24, %v92_v18  ;;  %v76_v31 = vadd.f32 %v75_v25, %v74_v19 }
  0x32   :  { %v103_v32 = vrot.slane %v102_v26, 1  ;;  %v109_v39 = vrot.slane %v108_v33, 1  ;;  %p240_p6 = pnand %p239_p5, %p233_p2 }
  0x33   :  { %v89_v34 = vrot.slane %v88_v28, 1  ;;  %v71_v35 = vrot.slane %v70_v29, 1  ;;  %v95_v36 = vrot.slane %v94_v30, 1  ;;  %v77_v37 = vrot.slane %v76_v31, 1 }
  0x34   :  { %v104_v38 = vadd.f32 %v103_v32, %v102_v26  ;;  %v110_v46 = vadd.f32 %v109_v39, %v108_v33 }
  0x35   :  { %v90_v40 = vadd.f32 %v89_v34, %v88_v28  ;;  %v72_v41 = vadd.f32 %v71_v35, %v70_v29  ;;  %v96_v42 = vadd.f32 %v95_v36, %v94_v30  ;;  %v78_v44 = vadd.f32 %v77_v37, %v76_v31 }
  0x36   :  { %v131_v50 = vsel %vm116_vm2, %v110_v46, %v104_v38 }
  0x37   :  { %v124_v48 = vsel %vm116_vm2, %v96_v42, %v90_v40  ;;  %v117_v49 = vsel %vm116_vm2, %v78_v44, %v72_v41  ;;  %v133_v53 = vadd.f32 %v131_v50, %v128_v47 }
  0x38   :  { %v126_v51 = vadd.f32 %v124_v48, %v121_v43  ;;  %v119_v52 = vadd.f32 %v117_v49, %v113_v45 }
  0x39   :  { %134 = vst [vmem:[#allocation10] sm:$0x3] %v133_v53 }
  0x3a   :  { %127 = vst [vmem:[#allocation8] sm:$0x3] %v126_v51  ;;  %120 = vst [vmem:[#allocation7] sm:$0x3] %v119_v52 }
  0x3b   :  { %243 = shalt.err (!%p240_p6)
}
  0x3c   :  { %s244_s22 = scalar_lea.hbm %s416_s3, 32 }
  0x3d   :  { %p245_p7 = scmp.ne.s32.totalorder %s416_s3, %s244_s22  ;;  %p248_p8 = scmp.lt.u32.totalorder %s244_s22, %s416_s3 }
  0x3f   :  { %p250_p9 = pnand %p248_p8, %p245_p7 }
  0x41   :  { %253 = shalt.err (!%p250_p9)
}
  0x42   :  { %154 = dma.vmem_to_hbm [thread:$0]  %s152_s14, 32, %s416_s3, [#allocation9]  }
  0x43   :  { %s254_s29 = scalar_lea.vmem %s363_s16, 32  ;;  %p259_p11 = scmp.lt.s32.totalorder %s363_s16, %s363_s16 }
  0x44   :  { %p255_p10 = scmp.ne.s32.totalorder %s363_s16, %s254_s29  ;;  %p260_p12 = scmp.lt.s32.totalorder %s254_s29, %s254_s29 }
  0x46   :  { %p261_p13 = por %p260_p12, %p259_p11 }
  0x48   :  { %p262_p0 = pnand %p261_p13, %p255_p10 }
  0x4a   :  { %265 = shalt.err (!%p262_p0)
}
  0x4b   :  { %s266_s6 = scalar_lea.hbm %s415_s2, 32 }
  0x4c   :  { %p267_p1 = scmp.ne.s32.totalorder %s415_s2, %s266_s6  ;;  %p270_p2 = scmp.lt.u32.totalorder %s266_s6, %s415_s2 }
  0x4e   :  { %p272_p3 = pnand %p270_p2, %p267_p1 }
  0x50   :  { %275 = shalt.err (!%p272_p3)
}
  0x51   :  { %144 = dma.vmem_to_hbm [thread:$0]  %s363_s16, 32, %s415_s2, [#allocation4]  }
  0x52   :  { %s276_s12 = scalar_lea.vmem %s365_s18, 32  ;;  %p281_p5 = scmp.lt.s32.totalorder %s365_s18, %s365_s18 }
  0x53   :  { %p277_p4 = scmp.ne.s32.totalorder %s365_s18, %s276_s12  ;;  %p282_p6 = scmp.lt.s32.totalorder %s276_s12, %s276_s12 }
  0x55   :  { %p283_p7 = por %p282_p6, %p281_p5 }
  0x57   :  { %p284_p8 = pnand %p283_p7, %p277_p4 }
  0x59   :  { %287 = shalt.err (!%p284_p8)
}
  0x5a   :  { %s288_s1 = scalar_lea.hbm %s417_s4, 32 }
  0x5b   :  { %p289_p9 = scmp.ne.s32.totalorder %s417_s4, %s288_s1  ;;  %p292_p10 = scmp.lt.u32.totalorder %s288_s1, %s417_s4 }
  0x5d   :  { %p294_p11 = pnand %p292_p10, %p289_p9 }
  0x5f   :  { %297 = shalt.err (!%p294_p11)
}
  0x60   :  { %164 = dma.vmem_to_hbm [thread:$0]  %s365_s18, 32, %s417_s4, [#allocation9]  }
  0x61   :  { %302 = dma.done.wait [#allocation4], 32  }
  0x62   :  { %303 = vsyncadd [#allocation4], 4294967264 }
  0x63   :  { %304 = dma.done.wait [#allocation9], 64  }
  0x64   :  { %305 = vsyncadd [#allocation9], 4294967232 }
  0x65   :  { %174 = vsyncpa [#allocation3], 1 }
  0x66   :  { %175 = vsyncpa [#allocation6], 1 }
  0x67   :  { %176 = vsyncpa [#allocation4], 1 }
  0x68   :  { %177 = vsyncpa [#allocation9], 1 }

</bundles_post_ra>
